<compile_context>
chip_gen: v7x
topology: tpu7x:2x2x1
jax: 0.10.0
libtpu: 0.0.40
codegen_flags: <defaults>
</compile_context>

<pallas_src>
import functools

import jax
import jax.numpy as jnp
import numpy as np
from jax.experimental import pallas as pl
from jax.experimental.pallas import tpu as pltpu

LANE = 128


def rnn_kernel(xT_ref, w_ref, wh_ref, b_ref, hn_ref, *, batch_size, num_steps):
    """Log-depth lane scan of a first-order linear recurrence over the batch axis.

    xT_ref : VMEM (D, B_pad) f32 -- x[:, 0, :]^T, batch on lanes, zero padded
    w_ref  : VMEM (D, 1)     f32 -- self.weight (hidden_size == 1)
    wh_ref : SMEM (1,)       f32 -- self.weight_h (flattened)
    b_ref  : SMEM (1,)       f32 -- self.bias
    hn_ref : VMEM (1, B_pad) f32 -- lane-dense h_n (h_n[t] lives on lane t)
    """
    b_pad = hn_ref.shape[1]
    wh = wh_ref[0]
    bias = b_ref[0]

    # addmm(bias, x_row, weight) for every t at once on the VPU (+ sublane
    # reduce on the XLU); skips a wasteful (B,D)@(D,1) MXU op.
    proj = jnp.sum(xT_ref[...] * w_ref[...], axis=0, keepdims=True) + bias  # (1, B_pad)

    lane = jax.lax.broadcasted_iota(jnp.int32, (1, b_pad), 1)
    # Zero the padded lanes (otherwise they would carry proj == bias).
    proj = jnp.where(lane < batch_size, proj, jnp.float32(0.0))

    # Hillis-Steele scan for  y[t] = proj[t] + wh * y[t-1],  y[-1] = 0:
    #   step j:  y[t] += wh^(2^j) * y[t - 2^j]   (zero where t < 2^j)
    # pltpu.roll (XLU) + fma (VPU) per step, single live vreg row.
    # NOTE: wh^(2^j) can overflow / flush to zero in f32 for |wh| far from 1
    # and very large batch -- but in that regime the sequential Horner result
    # itself overflows as wh^t, so behaviour matches the reference.
    y = proj
    wh_pow = wh
    for j in range(num_steps):
        s = 1 << j
        shifted = pltpu.roll(y, s, 1)                    # shifted[t] = y[t - s]
        shifted = jnp.where(lane >= s, shifted, jnp.float32(0.0))  # drop wrap
        y = y + wh_pow * shifted
        wh_pow = wh_pow * wh_pow

    hn_ref[...] = y  # single dense lane-major store (no per-row vst.msk)


@functools.partial(jax.jit, static_argnames=("batch_first",))
def vanilla_rnn_forward(x, weight, weight_h, bias, batch_first=True):
    """Glue: slicing, lane padding, pallas_call. Returns (h_n, y_h, y_hs)."""
    hidden_size = weight.shape[1]
    assert hidden_size == 1, "module forward requires hidden_size == 1"
    assert weight_h.shape == (1, hidden_size)
    assert bias.shape == (1,)

    # The forward only ever consumes x[:, 0, :] (batch_first) / x[0, :, :]
    # -- slice it directly instead of materializing a full transpose.
    x0 = x[:, 0, :] if batch_first else x[0, :, :]          # (batch, input)
    batch_size, input_size = x0.shape

    f32 = jnp.float32
    x0 = x0.astype(f32)
    w = weight.astype(f32)
    wh = weight_h.reshape(-1).astype(f32)                   # (1,) for 1-D SMEM
    b = bias.astype(f32)

    # Lane-dense layout: batch on the lane axis, padded to a multiple of 128.
    b_pad = max(LANE, ((batch_size + LANE - 1) // LANE) * LANE)
    xT = jnp.pad(x0.T, ((0, 0), (0, b_pad - batch_size)))   # (input, b_pad)

    # Scan only needs to cover distances up to batch_size - 1.
    num_steps = max(0, (batch_size - 1).bit_length())

    # TODO(synk): for very large batch, tile b_pad over a 1-D grid (blocked
    # (D, TILE_B) input via BlockSpec, per-tile local scans + wh^TILE_B carry
    # fixup) instead of one monolithic VMEM-resident input; not needed here.
    flops = 2 * input_size * b_pad + 3 * num_steps * b_pad
    bytes_accessed = 4 * (input_size * b_pad + input_size + 2 + b_pad)

    hn_lane = pl.pallas_call(
        functools.partial(rnn_kernel, batch_size=batch_size,
                          num_steps=num_steps),
        out_shape=jax.ShapeDtypeStruct((1, b_pad), f32),
        in_specs=[
            pl.BlockSpec(memory_space=pltpu.MemorySpace.VMEM),   # x0^T
            pl.BlockSpec(memory_space=pltpu.MemorySpace.VMEM),   # weight
            pl.BlockSpec(memory_space=pltpu.MemorySpace.SMEM),   # weight_h
            pl.BlockSpec(memory_space=pltpu.MemorySpace.SMEM),   # bias
        ],
        out_specs=pl.BlockSpec(memory_space=pltpu.MemorySpace.VMEM),
        cost_estimate=pl.CostEstimate(flops=flops, transcendentals=0,
                                      bytes_accessed=bytes_accessed),
    )(xT, w, wh, b)

    # y_h / y_hs are the last real lane; the scalar slice fuses for free under jit.
    h_n = hn_lane[0, :batch_size].reshape(batch_size, 1)
    y_h = hn_lane[0, batch_size - 1:batch_size].reshape(1, hidden_size)
    y_hs = y_h
    return h_n, y_h, y_hs


def reference_forward(x, weight, weight_h, bias, batch_first=True):
    """Pure-JAX line-by-line port of the PyTorch forward (for verification)."""
    if batch_first:
        x = jnp.transpose(x, (1, 0, 2))
    _, batch_size, _ = x.shape
    h_rows = []
    y_hs = jnp.zeros((1, weight.shape[1]), jnp.float32)
    y_h = y_hs
    for t in range(batch_size):
        y_h = bias[None, :] + x[0, t, :][None, :] @ weight + y_hs * weight_h
        y_hs = y_h
        h_rows.append(y_h[0, :1])
    h_n = jnp.stack(h_rows, axis=0)                # (batch, 1)
    return h_n, y_h, y_hs


if __name__ == "__main__":
    input_size = 16
    hidden_size = 1          # forward requires hidden_size == 1
    batch = 8
    seq = 4

    key = jax.random.PRNGKey(0)
    kx, kw, kwh, kb = jax.random.split(key, 4)

    # Deterministic parameter init matching torch.rand (uniform [0, 1)).
    weight = jax.random.uniform(kw, (input_size, hidden_size), jnp.float32)
    weight_h = jax.random.uniform(kwh, (1, hidden_size), jnp.float32)
    bias = jax.random.uniform(kb, (1,), jnp.float32)

    # Input: (batch, seq, input_size), batch_first=True.
    x = jax.random.normal(kx, (batch, seq, input_size), jnp.float32)

    h_n, y_h, y_hs = vanilla_rnn_forward(x, weight, weight_h, bias,
                                         batch_first=True)
    jax.block_until_ready((h_n, y_h, y_hs))

    # Verify against the pure-JAX reference of the PyTorch loop.
    h_ref, yh_ref, yhs_ref = reference_forward(x, weight, weight_h, bias,
                                               batch_first=True)
    assert h_n.shape == (batch, 1) and y_h.shape == (1, hidden_size)
    np.testing.assert_allclose(np.asarray(h_n), np.asarray(h_ref),
                               rtol=1e-5, atol=1e-5)
    np.testing.assert_allclose(np.asarray(y_h), np.asarray(yh_ref),
                               rtol=1e-5, atol=1e-5)
    np.testing.assert_allclose(np.asarray(y_hs), np.asarray(yhs_ref),
                               rtol=1e-5, atol=1e-5)

    print("KERNEL_OK")
</pallas_src>

<mosaic_0001>
module attributes {stable_mosaic.version = 11 : i64} {
  func.func @rnn_kernel(%arg0: memref<16x128xf32, #tpu.memory_space<vmem>>, %arg1: memref<16x1xf32, #tpu.memory_space<vmem>>, %arg2: memref<1xf32, #tpu.memory_space<smem>>, %arg3: memref<1xf32, #tpu.memory_space<smem>>, %arg4: memref<1x128xf32, #tpu.memory_space<vmem>>) attributes {dimension_semantics = [], scalar_prefetch = 0 : i64, scratch_operands = 0 : i64, tpu.core_type = #tpu.core_type<tc>} {
    %c0 = arith.constant 0 : index
    %0 = memref.load %arg2[%c0] : memref<1xf32, #tpu.memory_space<smem>>
    %c0_0 = arith.constant 0 : index
    %1 = memref.load %arg3[%c0_0] : memref<1xf32, #tpu.memory_space<smem>>
    %c0_1 = arith.constant 0 : index
    %c0_2 = arith.constant 0 : index
    %2 = vector.load %arg0[%c0_1, %c0_2] : memref<16x128xf32, #tpu.memory_space<vmem>>, vector<16x128xf32>
    %c0_3 = arith.constant 0 : index
    %c0_4 = arith.constant 0 : index
    %3 = vector.load %arg1[%c0_3, %c0_4] : memref<16x1xf32, #tpu.memory_space<vmem>>, vector<16x1xf32>
    %4 = vector.broadcast %3 : vector<16x1xf32> to vector<16x128xf32>
    %5 = arith.mulf %2, %4 : vector<16x128xf32>
    %cst = arith.constant dense<0.000000e+00> : vector<128xf32>
    %6 = vector.multi_reduction <add>, %5, %cst [0] : vector<16x128xf32> to vector<128xf32>
    %7 = vector.shape_cast %6 : vector<128xf32> to vector<1x128xf32>
    %8 = vector.broadcast %1 : f32 to vector<1x128xf32>
    %9 = arith.addf %7, %8 : vector<1x128xf32>
    %10 = tpu.iota {dimensions = array<i32: 1>} : vector<1x128xi32>
    %c8_i32 = arith.constant 8 : i32
    %11 = vector.broadcast %c8_i32 : i32 to vector<1x128xi32>
    %12 = arith.cmpi slt, %10, %11 : vector<1x128xi32>
    %cst_5 = arith.constant 0.000000e+00 : f32
    %13 = vector.broadcast %cst_5 : f32 to vector<1x128xf32>
    %14 = arith.select %12, %9, %13 : vector<1x128xi1>, vector<1x128xf32>
    %c1_i32 = arith.constant 1 : i32
    %15 = tpu.dynamic_rotate %14 by %c1_i32 dim 1 : vector<1x128xf32>, i32 -> vector<1x128xf32>
    %c1_i32_6 = arith.constant 1 : i32
    %16 = vector.broadcast %c1_i32_6 : i32 to vector<1x128xi32>
    %17 = arith.cmpi sge, %10, %16 : vector<1x128xi32>
    %cst_7 = arith.constant 0.000000e+00 : f32
    %18 = vector.broadcast %cst_7 : f32 to vector<1x128xf32>
    %19 = arith.select %17, %15, %18 : vector<1x128xi1>, vector<1x128xf32>
    %20 = vector.broadcast %0 : f32 to vector<1x128xf32>
    %21 = arith.mulf %20, %19 : vector<1x128xf32>
    %22 = arith.addf %14, %21 : vector<1x128xf32>
    %23 = arith.mulf %0, %0 : f32
    %c2_i32 = arith.constant 2 : i32
    %24 = tpu.dynamic_rotate %22 by %c2_i32 dim 1 : vector<1x128xf32>, i32 -> vector<1x128xf32>
    %c2_i32_8 = arith.constant 2 : i32
    %25 = vector.broadcast %c2_i32_8 : i32 to vector<1x128xi32>
    %26 = arith.cmpi sge, %10, %25 : vector<1x128xi32>
    %cst_9 = arith.constant 0.000000e+00 : f32
    %27 = vector.broadcast %cst_9 : f32 to vector<1x128xf32>
    %28 = arith.select %26, %24, %27 : vector<1x128xi1>, vector<1x128xf32>
    %29 = vector.broadcast %23 : f32 to vector<1x128xf32>
    %30 = arith.mulf %29, %28 : vector<1x128xf32>
    %31 = arith.addf %22, %30 : vector<1x128xf32>
    %32 = arith.mulf %23, %23 : f32
    %c4_i32 = arith.constant 4 : i32
    %33 = tpu.dynamic_rotate %31 by %c4_i32 dim 1 : vector<1x128xf32>, i32 -> vector<1x128xf32>
    %c4_i32_10 = arith.constant 4 : i32
    %34 = vector.broadcast %c4_i32_10 : i32 to vector<1x128xi32>
    %35 = arith.cmpi sge, %10, %34 : vector<1x128xi32>
    %cst_11 = arith.constant 0.000000e+00 : f32
    %36 = vector.broadcast %cst_11 : f32 to vector<1x128xf32>
    %37 = arith.select %35, %33, %36 : vector<1x128xi1>, vector<1x128xf32>
    %38 = vector.broadcast %32 : f32 to vector<1x128xf32>
    %39 = arith.mulf %38, %37 : vector<1x128xf32>
    %40 = arith.addf %31, %39 : vector<1x128xf32>
    %c0_12 = arith.constant 0 : index
    %c0_13 = arith.constant 0 : index
    %41 = vector.load %arg4[%c0_12, %c0_13] : memref<1x128xf32, #tpu.memory_space<vmem>>, vector<1x128xf32>
    tpu.vector_store %arg4[%c0_12, %c0_13], %40 {strides = array<i32>} : memref<1x128xf32, #tpu.memory_space<vmem>>, vector<1x128xf32>,
    return
  }
}

</mosaic_0001>

<bundles_post_ra>
// kernel: vanilla_rnn_forward.1
= control target key start
LH: loop header
LB: loop body
LE: loop exit
PB: predicated region body
PF: predicated region fallthrough
CT: control target
= control target key end

     0   :  { %v83_v0 = vmov 0   ;;  %v46_v12 = vlaneseq  ;;  %s85_s26 = smov 2   ;;  %s86_s29 = smov 4   ;;  %s137_s1 = inlined_call_operand.vmem [shape: f32[16,1], index: 1, kind: input, shape index: {}]   ;;  %s138_s0 = inlined_call_operand.vmem [shape: f32[16,128], index: 0, kind: input, shape index: {}]   ;;  %s139_s3 = inlined_call_operand.<no memory space> [shape: f32[1], index: 3, kind: input, shape index: {}]   ;;  %s140_s2 = inlined_call_operand.<no memory space> [shape: f32[1], index: 2, kind: input, shape index: {}]   ;;  %s141_s4 = inlined_call_operand.vmem [shape: f32[1,128], index: 4, kind: output, shape index: {}]  }
   0x1   :  { %82 = vset.pattern.permute.xlu0 %v83_v0  ;;  %v23_v1 = vld [vmem:[%s137_s1] sm:$0xff]  ;;  %v24_v2 = vld [vmem:[%s137_s1 + $0x8] sm:$0xff]  ;;  %v44_v17 = vstv %s139_s3  ;;  %v54_v21 = vstv %s140_s2  ;;  %s57_s3 = smul.f32 %s140_s2, %s140_s2 }
   0x2   :  { %27 = vperm.xlu0 %82, %v23_v1   ;;  %v21_v4 = vld [vmem:[%s138_s0] sm:$0xff]  ;;  %v22_v5 = vld [vmem:[%s138_s0 + $0x8] sm:$0xff]  ;;  %v47_v15 = vand.u32 127, %v46_v12  ;;  %s84_s0 = smov 1  }
   0x3   :  { %v62_v26 = vstv %s57_s3  ;;  %s65_s30 = smul.f32 %s57_s3, %s57_s3 }
   0x4   :  { %vm48_vm0 = vcmp.lt.s32.totalorder %v47_v15, 8  ;;  %vm52_vm1 = vcmp.ge.s32.totalorder %v47_v15, 1  ;;  %vm60_vm2 = vcmp.ge.s32.totalorder %v47_v15, 2  ;;  %vm68_vm3 = vcmp.ge.s32.totalorder %v47_v15, 4 }
   0x5   :  { %v70_v31 = vstv %s65_s30 }
   0x6   :  { %32 = vperm.xlu0 %82, %v24_v2  }
  0x81   :  { %v28_v3 = vpop.permute.xlu0 %27 }
  0x82   :  { %v35_v7 = vmul.f32 %v28_v3, %v21_v4 }
  0x85   :  { %v33_v6 = vpop.permute.xlu0 %32 }
  0x86   :  { %v36_v8 = vmul.f32 %v33_v6, %v22_v5 }
  0x88   :  { %v37_v9 = vadd.f32 %v36_v8, %v35_v7 }
  0x8a   :  { %v38_v10 = vrot.slane %v37_v9, 4 }
  0x8c   :  { %v39_v11 = vadd.f32 %v38_v10, %v37_v9 }
  0x8e   :  { %v40_v13 = vrot.slane %v39_v11, 2 }
  0x90   :  { %v41_v14 = vadd.f32 %v40_v13, %v39_v11 }
  0x92   :  { %v42_v16 = vrot.slane %v41_v14, 1 }
  0x94   :  { %v43_v18 = vadd.f32 %v42_v16, %v41_v14 }
  0x96   :  { %v45_v19 = vadd.f32 %v44_v17, %v43_v18 }
  0x98   :  { %v49_v20 = vsel %vm48_vm0, %v45_v19, 0.0 }
  0x99   :  { %50 = vrot.lane.b32.xlu1 %v49_v20, %s84_s0 }
 0x10b   :  { %v51_v22 = vpop.permute.xlu1 %50 }
 0x10c   :  { %v53_v23 = vsel %vm52_vm1, %v51_v22, 0.0 }
 0x10d   :  { %v55_v24 = vmul.f32 %v54_v21, %v53_v23 }
 0x10f   :  { %v56_v25 = vadd.f32 %v55_v24, %v49_v20 }
 0x111   :  { %58 = vrot.lane.b32.xlu1 %v56_v25, %s85_s26 }
 0x183   :  { %v59_v27 = vpop.permute.xlu1 %58 }
 0x184   :  { %v61_v28 = vsel %vm60_vm2, %v59_v27, 0.0 }
 0x185   :  { %v63_v29 = vmul.f32 %v62_v26, %v61_v28 }
 0x187   :  { %v64_v30 = vadd.f32 %v63_v29, %v56_v25 }
 0x189   :  { %66 = vrot.lane.b32.xlu0 %v64_v30, %s86_s29 }
 0x1fb   :  { %v67_v32 = vpop.permute.xlu0 %66 }
 0x1fc   :  { %v69_v33 = vsel %vm68_vm3, %v67_v32, 0.0 }
 0x1fd   :  { %v71_v34 = vmul.f32 %v70_v31, %v69_v33 }
 0x1ff   :  { %v72_v35 = vadd.f32 %v71_v34, %v64_v30 }
 0x201   :  { %73 = vst [vmem:[%s141_s4] sm:$0x1] %v72_v35 }

</bundles_post_ra>
